<compile_context>
chip_gen: v7x
topology: tpu7x:2x2x1
jax: 0.10.0
libtpu: 0.0.40
codegen_flags: <defaults>
</compile_context>

<pallas_src>
import functools

import jax
import jax.numpy as jnp
import numpy as np
from jax.experimental import pallas as pl
from jax.experimental.pallas import tpu as pltpu


def _round_up(x, m):
    return (x + m - 1) // m * m


def _conv3x3_kernel(x_ref, w_ref, b_ref, o_ref, patch_ref, *, wp):
    # x_ref    : (1, Cin, Lpad)   bf16  flattened reflection-padded image (1 batch)
    # w_ref    : (Cout, 9*Cin)    bf16  im2col weights (tap-major, Cin-minor)
    # b_ref    : (Cout, 1)        f32   bias
    # o_ref    : (1, Cout, Nout)  f32   flattened output rows (padded width Wp)
    # patch_ref: (9*Cin, Nout)    f32   VMEM scratch holding the im2col RHS
    cin = x_ref.shape[1]
    n_out = o_ref.shape[2]

    # Build the im2col matrix: tap (dy, dx) is a static lane-offset slice of the
    # flattened padded image at offset dy*Wp + dx.  Only lane shifts (XLU), no
    # sublane-crossing relayouts, no per-tap reshape copies.
    for dy in range(3):
        for dx in range(3):
            off = dy * wp + dx
            k0 = (dy * 3 + dx) * cin
            patch_ref[k0:k0 + cin, :] = (
                x_ref[0, :, off:off + n_out].astype(patch_ref.dtype)
            )

    # Single MXU matmul: K = 9*Cin, N = Nout (lane-dense), f32 accumulate.
    patches = patch_ref[...].astype(w_ref.dtype)          # bf16 for the MXU
    acc = jnp.dot(w_ref[...], patches, preferred_element_type=jnp.float32)
    o_ref[0] = (acc + b_ref[...]).astype(o_ref.dtype)     # f32 bias epilogue


def conv3x3_pallas(x_nchw, weight, bias):
    """ReflectionPad2d(1) + 3x3 conv, matching PyTorch Conv3x3.forward.

    x_nchw : (B, Cin, H, W)
    weight : (Cout, Cin, 3, 3)   (PyTorch OIHW layout)
    bias   : (Cout,)
    returns: (B, Cout, H, W)
    """
    B, Cin, H, W = x_nchw.shape
    Cout = weight.shape[0]
    Hp, Wp = H + 2, W + 2

    # Reflection pad (cheap glue, no layout transpose needed anymore).
    # TODO(synk): fold the 1-px reflect border into the kernel to remove this HBM
    # round trip for very large images.
    x_pad = jnp.pad(x_nchw, ((0, 0), (0, 0), (1, 1), (1, 1)), mode="reflect")

    # Flatten the padded spatial dims onto the lane axis.  Output rows keep the
    # padded width Wp so every tap is a contiguous lane slice; the 2 junk columns
    # per row are trimmed in the wrapper.  Pad so every tap slice stays in bounds
    # and the output width is a multiple of 128 (unmasked stores).
    L = Hp * Wp
    n_out = _round_up(H * Wp, 128)                 # flattened output width
    l_pad = _round_up(n_out + 2 * Wp + 2, 128)     # flattened (zero-padded) input
    x_flat = x_pad.reshape(B, Cin, L)
    x_flat = jnp.pad(x_flat, ((0, 0), (0, 0), (0, l_pad - L)))
    x_flat = x_flat.astype(jnp.bfloat16)

    # (Cout, Cin, 3, 3) -> (Cout, 9*Cin), tap-major / Cin-minor (matches kernel).
    w2 = jnp.transpose(weight, (0, 2, 3, 1)).reshape(Cout, 9 * Cin)
    w2 = w2.astype(jnp.bfloat16)
    b2 = bias.reshape(Cout, 1).astype(jnp.float32)

    kernel = functools.partial(_conv3x3_kernel, wp=Wp)

    out_flat = pl.pallas_call(
        kernel,
        out_shape=jax.ShapeDtypeStruct((B, Cout, n_out), jnp.float32),
        grid=(B,),
        in_specs=[
            pl.BlockSpec((1, Cin, l_pad), lambda b: (b, 0, 0)),
            pl.BlockSpec((Cout, 9 * Cin), lambda b: (0, 0)),
            pl.BlockSpec((Cout, 1), lambda b: (0, 0)),
        ],
        out_specs=pl.BlockSpec((1, Cout, n_out), lambda b: (b, 0, 0)),
        scratch_shapes=[pltpu.VMEM((9 * Cin, n_out), jnp.float32)],
        compiler_params=pltpu.CompilerParams(
            dimension_semantics=("parallel",),
            vmem_limit_bytes=32 * 1024 * 1024,
        ),
    )(x_flat, w2, b2)

    # TODO(synk): add H-tiling with a 2-row halo (pl.Element offsets or manual
    # make_async_copy) so the grid becomes (B, H_tiles) — gives double-buffered
    # pipelining for large images and shards across v7x's 2 TensorCores at B=1.

    # Rows of the flattened output have padded width Wp; keep the first W columns.
    out = out_flat[:, :, :H * Wp].reshape(B, Cout, H, Wp)[:, :, :, :W]
    return out.astype(x_nchw.dtype)


def _reference_conv3x3(x_nchw, weight, bias):
    """Pure-JAX reference (reflection pad + conv) for correctness check."""
    x_pad = jnp.pad(x_nchw, ((0, 0), (0, 0), (1, 1), (1, 1)), mode="reflect")
    out = jax.lax.conv_general_dilated(
        x_pad, weight, window_strides=(1, 1), padding="VALID",
        dimension_numbers=("NCHW", "OIHW", "NCHW"),
        precision=jax.lax.Precision.HIGHEST,
    )
    return out + bias.reshape(1, -1, 1, 1)


if __name__ == "__main__":
    key = jax.random.PRNGKey(0)
    B, Cin, Cout, H, W = 2, 4, 8, 16, 16

    kx, kw, kb = jax.random.split(key, 3)
    x = jax.random.normal(kx, (B, Cin, H, W), dtype=jnp.float32)

    # Deterministic Conv2d-style init (kaiming-uniform-like bounds).
    fan_in = Cin * 3 * 3
    bound = float(np.sqrt(1.0 / fan_in))
    weight = jax.random.uniform(
        kw, (Cout, Cin, 3, 3), minval=-bound, maxval=bound, dtype=jnp.float32
    )
    bias = jax.random.uniform(
        kb, (Cout,), minval=-bound, maxval=bound, dtype=jnp.float32
    )

    out = jax.block_until_ready(conv3x3_pallas(x, weight, bias))
    assert out.shape == (B, Cout, H, W)

    # Tight check: reference fed the same bf16-rounded operands (the kernel feeds
    # the MXU bf16 inputs with f32 accumulation, as requested by the perf review).
    x_q = x.astype(jnp.bfloat16).astype(jnp.float32)
    w_q = weight.astype(jnp.bfloat16).astype(jnp.float32)
    ref_q = jax.block_until_ready(_reference_conv3x3(x_q, w_q, bias))
    np.testing.assert_allclose(np.asarray(out), np.asarray(ref_q),
                               rtol=1e-4, atol=1e-4)

    # Loose check against the full-f32 PyTorch-equivalent reference.
    ref = jax.block_until_ready(_reference_conv3x3(x, weight, bias))
    np.testing.assert_allclose(np.asarray(out), np.asarray(ref),
                               rtol=1e-1, atol=1e-1)

    print("KERNEL_OK")
</pallas_src>

<mosaic_0001>
module attributes {stable_mosaic.version = 11 : i64} {
  func.func @_conv3x3_kernel(%arg0: i32, %arg1: memref<1x4x512xbf16, #tpu.memory_space<vmem>>, %arg2: memref<8x36xbf16, #tpu.memory_space<vmem>>, %arg3: memref<8x1xf32, #tpu.memory_space<vmem>>, %arg4: memref<1x8x384xf32, #tpu.memory_space<vmem>>, %arg5: memref<36x384xf32, #tpu.memory_space<vmem>>) attributes {dimension_semantics = [#tpu.dimension_semantics<parallel>], iteration_bounds = array<i64: 2>, scalar_prefetch = 0 : i64, scratch_operands = 1 : i64, tpu.core_type = #tpu.core_type<tc>, window_params = [{transform_indices = @transform_0, window_bounds = array<i64: 1, 4, 512>}, {pipeline_mode = #tpu.pipeline_mode<synchronous>, transform_indices = @transform_1, window_bounds = array<i64: 8, 36>}, {pipeline_mode = #tpu.pipeline_mode<synchronous>, transform_indices = @transform_2, window_bounds = array<i64: 8, 1>}, {transform_indices = @transform_3, window_bounds = array<i64: 1, 8, 384>}]} {
    %c0 = arith.constant 0 : index
    %c0_0 = arith.constant 0 : index
    %c0_1 = arith.constant 0 : index
    %0 = vector.load %arg1[%c0, %c0_0, %c0_1] : memref<1x4x512xbf16, #tpu.memory_space<vmem>>, vector<1x4x384xbf16>
    %1 = vector.shape_cast %0 : vector<1x4x384xbf16> to vector<4x384xbf16>
    %2 = arith.extf %1 : vector<4x384xbf16> to vector<4x384xf32>
    %c0_2 = arith.constant 0 : index
    %c0_3 = arith.constant 0 : index
    %3 = vector.load %arg5[%c0_2, %c0_3] : memref<36x384xf32, #tpu.memory_space<vmem>>, vector<4x384xf32>
    tpu.vector_store %arg5[%c0_2, %c0_3], %2 {strides = array<i32>} : memref<36x384xf32, #tpu.memory_space<vmem>>, vector<4x384xf32>,
    %c0_4 = arith.constant 0 : index
    %c0_5 = arith.constant 0 : index
    %c1 = arith.constant 1 : index
    %4 = vector.load %arg1[%c0_4, %c0_5, %c1] : memref<1x4x512xbf16, #tpu.memory_space<vmem>>, vector<1x4x384xbf16>
    %5 = vector.shape_cast %4 : vector<1x4x384xbf16> to vector<4x384xbf16>
    %6 = arith.extf %5 : vector<4x384xbf16> to vector<4x384xf32>
    %c4 = arith.constant 4 : index
    %c0_6 = arith.constant 0 : index
    %7 = vector.load %arg5[%c4, %c0_6] : memref<36x384xf32, #tpu.memory_space<vmem>>, vector<4x384xf32>
    tpu.vector_store %arg5[%c4, %c0_6], %6 {strides = array<i32>} : memref<36x384xf32, #tpu.memory_space<vmem>>, vector<4x384xf32>,
    %c0_7 = arith.constant 0 : index
    %c0_8 = arith.constant 0 : index
    %c2 = arith.constant 2 : index
    %8 = vector.load %arg1[%c0_7, %c0_8, %c2] : memref<1x4x512xbf16, #tpu.memory_space<vmem>>, vector<1x4x384xbf16>
    %9 = vector.shape_cast %8 : vector<1x4x384xbf16> to vector<4x384xbf16>
    %10 = arith.extf %9 : vector<4x384xbf16> to vector<4x384xf32>
    %c8 = arith.constant 8 : index
    %c0_9 = arith.constant 0 : index
    %11 = vector.load %arg5[%c8, %c0_9] : memref<36x384xf32, #tpu.memory_space<vmem>>, vector<4x384xf32>
    tpu.vector_store %arg5[%c8, %c0_9], %10 {strides = array<i32>} : memref<36x384xf32, #tpu.memory_space<vmem>>, vector<4x384xf32>,
    %c0_10 = arith.constant 0 : index
    %c0_11 = arith.constant 0 : index
    %c18 = arith.constant 18 : index
    %12 = vector.load %arg1[%c0_10, %c0_11, %c18] : memref<1x4x512xbf16, #tpu.memory_space<vmem>>, vector<1x4x384xbf16>
    %13 = vector.shape_cast %12 : vector<1x4x384xbf16> to vector<4x384xbf16>
    %14 = arith.extf %13 : vector<4x384xbf16> to vector<4x384xf32>
    %c12 = arith.constant 12 : index
    %c0_12 = arith.constant 0 : index
    %15 = vector.load %arg5[%c12, %c0_12] : memref<36x384xf32, #tpu.memory_space<vmem>>, vector<4x384xf32>
    tpu.vector_store %arg5[%c12, %c0_12], %14 {strides = array<i32>} : memref<36x384xf32, #tpu.memory_space<vmem>>, vector<4x384xf32>,
    %c0_13 = arith.constant 0 : index
    %c0_14 = arith.constant 0 : index
    %c19 = arith.constant 19 : index
    %16 = vector.load %arg1[%c0_13, %c0_14, %c19] : memref<1x4x512xbf16, #tpu.memory_space<vmem>>, vector<1x4x384xbf16>
    %17 = vector.shape_cast %16 : vector<1x4x384xbf16> to vector<4x384xbf16>
    %18 = arith.extf %17 : vector<4x384xbf16> to vector<4x384xf32>
    %c16 = arith.constant 16 : index
    %c0_15 = arith.constant 0 : index
    %19 = vector.load %arg5[%c16, %c0_15] : memref<36x384xf32, #tpu.memory_space<vmem>>, vector<4x384xf32>
    tpu.vector_store %arg5[%c16, %c0_15], %18 {strides = array<i32>} : memref<36x384xf32, #tpu.memory_space<vmem>>, vector<4x384xf32>,
    %c0_16 = arith.constant 0 : index
    %c0_17 = arith.constant 0 : index
    %c20 = arith.constant 20 : index
    %20 = vector.load %arg1[%c0_16, %c0_17, %c20] : memref<1x4x512xbf16, #tpu.memory_space<vmem>>, vector<1x4x384xbf16>
    %21 = vector.shape_cast %20 : vector<1x4x384xbf16> to vector<4x384xbf16>
    %22 = arith.extf %21 : vector<4x384xbf16> to vector<4x384xf32>
    %c20_18 = arith.constant 20 : index
    %c0_19 = arith.constant 0 : index
    %23 = vector.load %arg5[%c20_18, %c0_19] : memref<36x384xf32, #tpu.memory_space<vmem>>, vector<4x384xf32>
    tpu.vector_store %arg5[%c20_18, %c0_19], %22 {strides = array<i32>} : memref<36x384xf32, #tpu.memory_space<vmem>>, vector<4x384xf32>,
    %c0_20 = arith.constant 0 : index
    %c0_21 = arith.constant 0 : index
    %c36 = arith.constant 36 : index
    %24 = vector.load %arg1[%c0_20, %c0_21, %c36] : memref<1x4x512xbf16, #tpu.memory_space<vmem>>, vector<1x4x384xbf16>
    %25 = vector.shape_cast %24 : vector<1x4x384xbf16> to vector<4x384xbf16>
    %26 = arith.extf %25 : vector<4x384xbf16> to vector<4x384xf32>
    %c24 = arith.constant 24 : index
    %c0_22 = arith.constant 0 : index
    %27 = vector.load %arg5[%c24, %c0_22] : memref<36x384xf32, #tpu.memory_space<vmem>>, vector<4x384xf32>
    tpu.vector_store %arg5[%c24, %c0_22], %26 {strides = array<i32>} : memref<36x384xf32, #tpu.memory_space<vmem>>, vector<4x384xf32>,
    %c0_23 = arith.constant 0 : index
    %c0_24 = arith.constant 0 : index
    %c37 = arith.constant 37 : index
    %28 = vector.load %arg1[%c0_23, %c0_24, %c37] : memref<1x4x512xbf16, #tpu.memory_space<vmem>>, vector<1x4x384xbf16>
    %29 = vector.shape_cast %28 : vector<1x4x384xbf16> to vector<4x384xbf16>
    %30 = arith.extf %29 : vector<4x384xbf16> to vector<4x384xf32>
    %c28 = arith.constant 28 : index
    %c0_25 = arith.constant 0 : index
    %31 = vector.load %arg5[%c28, %c0_25] : memref<36x384xf32, #tpu.memory_space<vmem>>, vector<4x384xf32>
    tpu.vector_store %arg5[%c28, %c0_25], %30 {strides = array<i32>} : memref<36x384xf32, #tpu.memory_space<vmem>>, vector<4x384xf32>,
    %c0_26 = arith.constant 0 : index
    %c0_27 = arith.constant 0 : index
    %c38 = arith.constant 38 : index
    %32 = vector.load %arg1[%c0_26, %c0_27, %c38] : memref<1x4x512xbf16, #tpu.memory_space<vmem>>, vector<1x4x384xbf16>
    %33 = vector.shape_cast %32 : vector<1x4x384xbf16> to vector<4x384xbf16>
    %34 = arith.extf %33 : vector<4x384xbf16> to vector<4x384xf32>
    %c32 = arith.constant 32 : index
    %c0_28 = arith.constant 0 : index
    %35 = vector.load %arg5[%c32, %c0_28] : memref<36x384xf32, #tpu.memory_space<vmem>>, vector<4x384xf32>
    tpu.vector_store %arg5[%c32, %c0_28], %34 {strides = array<i32>} : memref<36x384xf32, #tpu.memory_space<vmem>>, vector<4x384xf32>,
    %c0_29 = arith.constant 0 : index
    %c0_30 = arith.constant 0 : index
    %36 = vector.load %arg5[%c0_29, %c0_30] : memref<36x384xf32, #tpu.memory_space<vmem>>, vector<36x384xf32>
    %37 = arith.truncf %36 : vector<36x384xf32> to vector<36x384xbf16>
    %c0_31 = arith.constant 0 : index
    %c0_32 = arith.constant 0 : index
    %38 = vector.load %arg2[%c0_31, %c0_32] : memref<8x36xbf16, #tpu.memory_space<vmem>>, vector<8x36xbf16>
    %cst = arith.constant dense<0.000000e+00> : vector<8x384xf32>
    %39 = tpu.matmul %38, %37, %cst {dimension_numbers = #tpu.dot_dimension_numbers<[1], [0], [0], [1], [0, 0, 1, 1], [], []>} : vector<8x36xbf16>, vector<36x384xbf16>, vector<8x384xf32> -> vector<8x384xf32>
    %c0_33 = arith.constant 0 : index
    %c0_34 = arith.constant 0 : index
    %40 = vector.load %arg3[%c0_33, %c0_34] : memref<8x1xf32, #tpu.memory_space<vmem>>, vector<8x1xf32>
    %41 = vector.broadcast %40 : vector<8x1xf32> to vector<8x384xf32>
    %42 = arith.addf %39, %41 : vector<8x384xf32>
    %c0_35 = arith.constant 0 : index
    %c0_36 = arith.constant 0 : index
    %c0_37 = arith.constant 0 : index
    %43 = vector.load %arg4[%c0_35, %c0_36, %c0_37] : memref<1x8x384xf32, #tpu.memory_space<vmem>>, vector<1x8x384xf32>
    %44 = vector.shape_cast %43 : vector<1x8x384xf32> to vector<8x384xf32>
    %45 = vector.shape_cast %42 : vector<8x384xf32> to vector<1x8x384xf32>
    tpu.vector_store %arg4[%c0_35, %c0_36, %c0_37], %45 {strides = array<i32>} : memref<1x8x384xf32, #tpu.memory_space<vmem>>, vector<1x8x384xf32>,
    return
  }
  func.func @transform_0(%arg0: i32) -> (i32, i32, i32) {
    %c0_i32 = arith.constant 0 : i32
    %c0_i32_0 = arith.constant 0 : i32
    %c0_i32_1 = arith.constant 0 : i32
    return %arg0, %c0_i32, %c0_i32_0 : i32, i32, i32
  }
  func.func @transform_1(%arg0: i32) -> (i32, i32) {
    %c0_i32 = arith.constant 0 : i32
    %c0_i32_0 = arith.constant 0 : i32
    %c0_i32_1 = arith.constant 0 : i32
    return %c0_i32, %c0_i32_0 : i32, i32
  }
  func.func @transform_2(%arg0: i32) -> (i32, i32) {
    %c0_i32 = arith.constant 0 : i32
    %c0_i32_0 = arith.constant 0 : i32
    %c0_i32_1 = arith.constant 0 : i32
    return %c0_i32, %c0_i32_0 : i32, i32
  }
  func.func @transform_3(%arg0: i32) -> (i32, i32, i32) {
    %c0_i32 = arith.constant 0 : i32
    %c0_i32_0 = arith.constant 0 : i32
    %c0_i32_1 = arith.constant 0 : i32
    return %arg0, %c0_i32, %c0_i32_0 : i32, i32, i32
  }
}

</mosaic_0001>

<bundles_post_ra>
// kernel: tpu_custom_call.1
= control target key start
LH: loop header
LB: loop body
LE: loop exit
PB: predicated region body
PF: predicated region fallthrough
CT: control target
= control target key end

     0   :  { %8 = vsyncpa [#allocation4], 0  ;;  %s1104_s0 = inlined_call_operand.hbm [shape: bf16[2,4,512], index: 0, kind: input, shape index: {}]   ;;  %s1105_s1 = inlined_call_operand.vmem [shape: bf16[8,36], index: 1, kind: input, shape index: {}]   ;;  %s1106_s2 = inlined_call_operand.vmem [shape: f32[8,1], index: 2, kind: input, shape index: {}]   ;;  %s1107_s3 = inlined_call_operand.hbm [shape: f32[2,8,384], index: 3, kind: output, shape index: {}]  }
   0x1   :  { %10 = vsyncpa [#allocation4 + $0x1], 0 }
   0x2   :  { %11 = vsyncpa [#allocation5], 0 }
   0x3   :  { %13 = vsyncpa [#allocation5 + $0x1], 0  ;;  %s911_s12 = smov 0   ;;  %s913_s13 = smov 0  }
   0x4   :  { %s915_s14 = smov 0   ;;  %s917_s15 = smov 0  }
   0x5 LB: > { %s932_s16 = sadd.s32 4294967295, %s876_s15   ;;  %s611_s17 = sadd.s32 4294967294, %s876_s15   ;;  %s876_s15 = sphi %s917_s15, %s1122_s15   ;;  %s872_s14 = sphi %s915_s14, %s1121_s14   ;;  %s868_s13 = sphi %s913_s13, %s1120_s13   ;;  %s864_s12 = sphi %s911_s12, %s1119_s12  }
   0x6   : > { %s936_s18 = sadd.s32 1, %s876_s15   ;;  %s26_s19 = sadd.s32 1, %s872_s14 }
   0x7   : > { %s23_s20 = ssub.s32 %s876_s15, %s936_s18  ;;  %p33_p0 = scmp.ne.s32.totalorder %s872_s14, %s868_s13 }
   0x8   : > { %p24_p1 = scmp.eq.s32.totalorder %s23_s20, 0  ;;  %p34_p2 = scmp.eq.s32.totalorder %s876_s15, 0 }
   0x9   : > { %p39_p3 = scmp.ne.s32.totalorder %s868_s13, %s864_s12  ;;  %p40_p4 = scmp.eq.s32.totalorder %s932_s16, 0 }
   0xa   : > { %s948_s21 = scalar_select %p24_p1, %s872_s14, %s26_s19  }
   0xb   : > { %p950_p5 = por %p34_p2, %p33_p0  ;;  %p954_p6 = por %p40_p4, %p39_p3 }
   0xc   : > { %p105_p7 = scmp.eq.s32.totalorder %s932_s16, 1  ;;  %p111_p8 = scmp.eq.s32.totalorder %s611_s17, 1 }
   0xd   : > { %p654_p10 = scmp.lt.s32.totalorder %s876_s15, 2  ;;  %s137_s26 = sand.u32 1, %s872_s14  }
   0xe   : > { %p961_p11 = por %p105_p7, %p33_p0  ;;  %p965_p12 = por %p111_p8, %p39_p3 }
   0xf   : > { %s625_s27 = sshll.u32 %s876_s15, 7  ;;  %s614_s28 = sshll.u32 %s137_s26, 3 }
  0x10   : > { %s1111_s24 = scalar_select %p961_p11, 1, 0 }
  0x11   : > { %s1112_s25 = scalar_select %p965_p12, 1, 0 }
  0x12   : > { %s974_s4 = scalar_lea.hbm %s1104_s0, %s625_s27  ;;  %s141_s5 = scalar_lea.vmem [#allocation3], %s614_s28 }
  0x13   : > { %s149_s6 = sshll.u32 %s141_s5, 4  ;;  %p978_p13 = pnand %p654_p10, %p950_p5  ;;  %s982_s6 = int_to_ptr.vmem [resolvable:$true] %s149_s6 }
  0x14   : > { %s138_s8 = scalar_lea.sflag [#allocation4], %s137_s26  ;;  %s780_s9 = scalar_lea.hbm %s974_s4, 128 }
  0x15   : > { %p781_p2 = scmp.ne.s32.totalorder %s974_s4, %s780_s9  ;;  %p782_p3 = pneg %p978_p13 }
  0x16   : > { %s785_s17 = scalar_lea.hbm %s1104_s0, 256  ;;  %p786_p5 = scmp.lt.u32.totalorder %s974_s4, %s1104_s0 }
  0x17   : > { %p783_p4 = pnand %p782_p3, %p781_p2  ;;  %p787_p8 = scmp.lt.u32.totalorder %s785_s17, %s780_s9 }
  0x18   : > { %p789_p9 = scmp.lt.u32.totalorder %s780_s9, %s974_s4 }
  0x19   : > { %p784_p7 = pneg %p783_p4  ;;  %p788_p10 = por %p787_p8, %p786_p5 }
  0x1b   : > { %p790_p0 = por %p789_p9, %p788_p10 }
  0x1d   : > { %p791_p1 = pnand %p790_p0, %p784_p7 }
  0x1f   : > { %794 = shalt.err (!%p791_p1)
}
  0x20   : > { %s795_s22 = scalar_lea.vmem %s982_s6, 128  ;;  %s878_s26 = smov [#allocation3]  }
  0x21   : > { %p796_p2 = scmp.ne.s32.totalorder %s982_s6, %s795_s22  ;;  %s800_s27 = sshll.u32 %s878_s26, 4  ;;  %s801_s27 = int_to_ptr.vmem [resolvable:$false] %s800_s27 }
  0x22   : > { %s802_s28 = scalar_lea.vmem %s801_s27, 256  ;;  %p803_p11 = scmp.lt.s32.totalorder %s982_s6, %s801_s27 }
  0x23   : > { %p798_p4 = pnand %p796_p2, %p782_p3  ;;  %p804_p5 = scmp.lt.s32.totalorder %s802_s28, %s795_s22 }
  0x25   : > { %p799_p12 = pneg %p798_p4  ;;  %p805_p8 = por %p804_p5, %p803_p11 }
  0x27   : > { %p806_p9 = pnand %p805_p8, %p799_p12 }
  0x29   : > { %809 = shalt.err (!%p806_p9)
}
  0x2a   : > { %649 = dma.hbm_to_vmem [thread:$0]  (!%p978_p13), %s974_s4, 128, %s982_s6, %s138_s8  }
  0x2b   : > { %p1114_p0 = scmp.lt.s32.totalorder %s876_s15, 3  ;;  %p1115_p1 = scmp.ge.s32.totalorder %s876_s15, 1 }
  0x2d   : > { %p155_p3 = pnand %p1115_p1, %p1114_p0 }
  0x2e   : > { %s1016_s29 = sand.u32 (!%p155_p3), 1, %s868_s13  }
  0x2f   : > { %158 = sbr.rel (%p155_p3) target bundleno = 451 (0x1c3), region = 32  ;;  %s618_s30 = sshll.u32 (!%p155_p3), %s1016_s29, 3 }
  0x30   : > { %s161_s5 = scalar_lea.sflag (!%p155_p3), [#allocation4], %s1016_s29  ;;  %s164_s9 = scalar_lea.vmem (!%p155_p3), [#allocation3], %s618_s30 }
  0x36   : > { %855 = dma.done.wait (%p954_p6), %s161_s5, 128  }
  0x37   : > { %857 = vsyncadd (%p954_p6), %s161_s5, 4294967168  ;;  %v247_v0 = vld [vmem:[%s164_s9] sm:$0xff]  ;;  %s879_s4 = smov 110   ;;  %s880_s6 = smov 127   ;;  %v882_v15 = vmov 0.0   ;;  %v888_v18 = vmov 0  }
  0x38   : > { %v188_v1 = vld [vmem:[%s164_s9] sm:$0x3f]  ;;  %v248_v2 = vunpack.c.l.bf16 %v247_v0  ;;  %v249_v3 = vunpack.c.h.bf16 %v247_v0  ;;  %s881_s23 = smov 126   ;;  %630 = vmatprep.subr.bf16.mxu1 %v882_v15  ;;  %s883_s7 = smov 109   ;;  %474 = vmatprep.mubr.bf16.mxu0 %v888_v18  ;;  %vm889_vm0 = vmmov 0   ;;  %vm262_vm1 = vcmask 900096  }
  0x39   : > { %v189_v4 = vunpack.c.l.bf16 %v188_v1  ;;  %v190_v5 = vunpack.c.h.bf16 %v188_v1  ;;  %s884_s8 = smov 108   ;;  %s885_s10 = smov 92   ;;  %636 = vmatprep.mubr.msk.bf16.mxu1 %vm889_vm0, %v882_v15  ;;  %779 = vset.pattern.permute.xlu0 %v888_v18  ;;  %v422_v19 = vld [vmem:[%s1106_s2] sm:$0xff]  ;;  %vm212_vm2 = vcmask 1039360   ;;  %vm237_vm3 = vcmask 1031168  }
  0x3a   : > { %v253_v6 = vcombine.low %v249_v3, %v249_v3  ;;  %v252_v7 = vcombine.low %v248_v2, %v248_v2  ;;  %v227_v8 = vcombine.high %v248_v2, %v248_v2  ;;  %v228_v12 = vcombine.high %v249_v3, %v249_v3  ;;  %s886_s11 = smov 91   ;;  %s887_s17 = smov 90  }
  0x3b   : > { %194 = vst [vmem:[#allocation2] sm:$0xf] %v189_v4  ;;  %196 = vst [vmem:[#allocation2 + $0x10] sm:$0xf] %v190_v5  ;;  %v192_v13 = vcombine.high %v189_v4, %v189_v4  ;;  %vm287_vm4 = vcmask 891904   ;;  %vm312_vm5 = vcmask 883712  }
  0x3c   : > { %v709_v9 = vpack.i.bf16 %v253_v6, %v248_v2  ;;  %v704_v10 = vpack.i.bf16 %v249_v3, %v227_v8  ;;  %v714_v11 = vpack.i.bf16 %v249_v3, %v252_v7  ;;  %v719_v14 = vpack.i.bf16 %v228_v12, %v248_v2  ;;  %s640_s27 = smul.u32 24, %s1016_s29  ;;  %p1116_p11 = scmp.ne.s32.totalorder %s1111_s24, 0 }
  0x3d   : > { %195 = vst [vmem:[#allocation2 + $0x8] sm:$0xf] %v192_v13  ;;  %v769_v16 = vpack.i.bf16 %v227_v8, %v248_v2  ;;  %v774_v17 = vpack.i.bf16 %v228_v12, %v249_v3  ;;  %vm337_vm6 = vcmask 752640   ;;  %vm362_vm7 = vcmask 744448   ;;  %s641_s28 = smul.u32 384, %s932_s16  ;;  %s527_s16 = scalar_lea.sflag [#allocation5], %s1016_s29 }
  0x3e   : > { %710 = vrot.lane.b32.xlu1 %v709_v9, %s879_s4  ;;  %700 = vrot.lane.b32.xlu0 %v709_v9, %s880_s6  ;;  %vm387_vm8 = vcmask 736256   ;;  %vm432_vm9 = vcmask 1041408   ;;  %vm428_vm10 = vcmask 293888   ;;  %s186_s30 = scalar_lea.vmem [#allocation6], %s640_s27 }
  0x3f   : > { %s541_s5 = sshll.u32 %s186_s30, 4  ;;  %s1062_s5 = int_to_ptr.vmem [resolvable:$true] %s541_s5 }
  0x42   : > { %705 = vrot.lane.b32.xlu0 %v704_v10, %s881_s23  ;;  %715 = vrot.lane.b32.xlu1 %v714_v11, %s880_s6  ;;  %s1060_s6 = scalar_lea.hbm %s1107_s3, %s641_s28 }
  0x46   : > { %720 = vrot.lane.b32.xlu0 %v719_v14, %s881_s23  ;;  %725 = vrot.lane.b32.xlu1 %v714_v11, %s879_s4  ;;  %s810_s23 = scalar_lea.vmem %s1062_s5, 384 }
  0x47   : > { %p811_p6 = scmp.ne.s32.totalorder %s1062_s5, %s810_s23 }
  0x49   : > { %p812_p12 = pnand %p811_p6, %p1116_p11 }
  0x4a   : > { %730 = vrot.lane.b32.xlu0 %v704_v10, %s883_s7  ;;  %735 = vrot.lane.b32.xlu1 %v709_v9, %s884_s8 }
  0x4b   : > { %p813_p13 = pneg %p812_p12 }
  0x4e   : > { %740 = vrot.lane.b32.xlu0 %v704_v10, %s885_s10  ;;  %745 = vrot.lane.b32.xlu1 %v709_v9, %s886_s11 }
  0x52   : > { %750 = vrot.lane.b32.xlu0 %v719_v14, %s883_s7  ;;  %755 = vrot.lane.b32.xlu1 %v714_v11, %s884_s8  ;;  %s890_s7 = smov [#allocation6]  }
  0x53   : > { %s814_s8 = sshll.u32 %s890_s7, 4  ;;  %s815_s8 = int_to_ptr.vmem [resolvable:$false] %s814_s8 }
  0x54   : > { %p817_p7 = scmp.lt.s32.totalorder %s1062_s5, %s815_s8 }
  0x56   : > { %760 = vrot.lane.b32.xlu0 %v719_v14, %s885_s10  ;;  %765 = vrot.lane.b32.xlu1 %v714_v11, %s886_s11  ;;  %s816_s10 = scalar_lea.vmem %s815_s8, 768 }
  0x57   : > { %p818_p10 = scmp.lt.s32.totalorder %s816_s10, %s810_s23 }
  0x59   : > { %p819_p2 = por %p818_p10, %p817_p7 }
  0x5a   : > { %770 = vrot.lane.b32.xlu0 %v769_v16, %s887_s17  ;;  %775 = vrot.lane.b32.xlu1 %v774_v17, %s887_s17 }
  0x5b   : > { %p820_p4 = pnand %p819_p2, %p813_p13 }
  0x5e   : > { %425 = vperm.xlu0 %779, %v422_v19  }
  0xb0   : > { %v711_v20 = vpop.permute.xlu1 %710  ;;  %v701_v21 = vpop.permute.xlu0 %700 }
  0xb1   : > { %v713_v22 = vunpack.i.h.bf16 %v711_v20  ;;  %v712_v23 = vunpack.i.l.bf16 %v711_v20  ;;  %v703_v24 = vunpack.i.h.bf16 %v701_v21  ;;  %v702_v25 = vunpack.i.l.bf16 %v701_v21 }
  0xb3   : > { %v264_v26 = vsel %vm262_vm1, %v712_v23, %v713_v22  ;;  %v214_v27 = vsel %vm212_vm2, %v702_v25, %v703_v24 }
  0xb4   : > { %270 = vst [vmem:[#allocation2 + $0x20] sm:$0xf0] %v264_v26  ;;  %220 = vst [vmem:[#allocation2 + $0x8] sm:$0xf0] %v214_v27  ;;  %v706_v28 = vpop.permute.xlu0 %705  ;;  %v716_v29 = vpop.permute.xlu1 %715 }
  0xb5   : > { %v708_v30 = vunpack.i.h.bf16 %v706_v28  ;;  %v707_v31 = vunpack.i.l.bf16 %v706_v28  ;;  %v718_v32 = vunpack.i.h.bf16 %v716_v29  ;;  %v717_v33 = vunpack.i.l.bf16 %v716_v29 }
  0xb7   : > { %v239_v34 = vsel %vm237_vm3, %v707_v31, %v708_v30  ;;  %v215_v35 = vsel %vm212_vm2, %v703_v24, %v718_v32  ;;  %v213_v36 = vsel %vm212_vm2, %v717_v33, %v702_v25 }
  0xb8   : > { %245 = vst [vmem:[#allocation2 + $0x20] sm:$0xf] %v239_v34  ;;  %221 = vst [vmem:[#allocation2 + $0x10] sm:$0xf0] %v215_v35  ;;  %v721_v37 = vpop.permute.xlu0 %720  ;;  %v726_v38 = vpop.permute.xlu1 %725 }
  0xb9   : > { %219 = vst [vmem:[#allocation2] sm:$0xf0] %v213_v36  ;;  %v723_v39 = vunpack.i.h.bf16 %v721_v37  ;;  %v722_v40 = vunpack.i.l.bf16 %v721_v37  ;;  %v728_v41 = vunpack.i.h.bf16 %v726_v38  ;;  %v727_v42 = vunpack.i.l.bf16 %v726_v38 }
  0xbb   : > { %v238_v43 = vsel %vm237_vm3, %v722_v40, %v707_v31  ;;  %v240_v44 = vsel %vm237_vm3, %v708_v30, %v723_v39  ;;  %v265_v45 = vsel %vm262_vm1, %v713_v22, %v728_v41  ;;  %v263_v46 = vsel %vm262_vm1, %v727_v42, %v712_v23  ;;  %v398_v55 = vld [vmem:[#allocation2 + $0x8] sm:$0xff] }
  0xbc   : > { %244 = vst [vmem:[#allocation2 + $0x18] sm:$0xf] %v238_v43  ;;  %246 = vst [vmem:[#allocation2 + $0x28] sm:$0xf] %v240_v44  ;;  %v731_v47 = vpop.permute.xlu0 %730  ;;  %v736_v48 = vpop.permute.xlu1 %735 }
  0xbd   : > { %271 = vst [vmem:[#allocation2 + $0x28] sm:$0xf0] %v265_v45  ;;  %269 = vst [vmem:[#allocation2 + $0x18] sm:$0xf0] %v263_v46  ;;  %v733_v49 = vunpack.i.h.bf16 %v731_v47  ;;  %v732_v50 = vunpack.i.l.bf16 %v731_v47  ;;  %v738_v51 = vunpack.i.h.bf16 %v736_v48  ;;  %v737_v52 = vunpack.i.l.bf16 %v736_v48 }
  0xbf   : > { %v289_v53 = vsel %vm287_vm4, %v732_v50, %v733_v49  ;;  %v314_v54 = vsel %vm312_vm5, %v737_v52, %v738_v51  ;;  %v401_v56 = vld [vmem:[#allocation2 + $0x20] sm:$0xff]  ;;  %v399_v4 = vld [vmem:[#allocation2 + $0x10] sm:$0xff] }
  0xc0   : > { %295 = vst [vmem:[#allocation2 + $0x38] sm:$0xf] %v289_v53  ;;  %320 = vst [vmem:[#allocation2 + $0x38] sm:$0xf0] %v314_v54  ;;  %v741_v57 = vpop.permute.xlu0 %740  ;;  %v746_v58 = vpop.permute.xlu1 %745  ;;  %v413_v59 = vpack.c.bf16 %v401_v56, %v398_v55  ;;  %v397_v0 = vld [vmem:[#allocation2] sm:$0xff] }
  0xc1   : > { %v743_v60 = vunpack.i.h.bf16 %v741_v57  ;;  %v742_v61 = vunpack.i.l.bf16 %v741_v57  ;;  %v748_v62 = vunpack.i.h.bf16 %v746_v58  ;;  %v747_v63 = vunpack.i.l.bf16 %v746_v58  ;;  %v421_v55 = vld [vmem:[%s1105_s1] sm:$0xf] }
  0xc2   : > { %442 = vmatprep.subr.bf16.mxu0 %v413_v59 }
  0xc3   : > { %v339_v1 = vsel %vm337_vm6, %v742_v61, %v743_v60  ;;  %v364_v2 = vsel %vm362_vm7, %v747_v63, %v748_v62 }
  0xc4   : > { %v400_v3 = vld [vmem:[#allocation2 + $0x18] sm:$0xff]  ;;  %v402_v5 = vld [vmem:[#allocation2 + $0x28] sm:$0xff]  ;;  %345 = vst [vmem:[#allocation2 + $0x50] sm:$0xf] %v339_v1  ;;  %370 = vst [vmem:[#allocation2 + $0x50] sm:$0xf0] %v364_v2  ;;  %v751_v6 = vpop.permute.xlu0 %750  ;;  %v756_v7 = vpop.permute.xlu1 %755 }
  0xc5   : > { %v412_v8 = vpack.c.bf16 %v400_v3, %v397_v0  ;;  %v414_v9 = vpack.c.bf16 %v402_v5, %v399_v4  ;;  %v753_v10 = vunpack.i.h.bf16 %v751_v6  ;;  %v752_v11 = vunpack.i.l.bf16 %v751_v6 }
  0xc6   : > { %v758_v12 = vunpack.i.h.bf16 %v756_v7  ;;  %v757_v13 = vunpack.i.l.bf16 %v756_v7 }
  0xc7   : > { %443 = vmatpush1.bf16.msra.mxu0 %v412_v8  ;;  %631 = vmatpush3.bf16.msra.mxu1 %v414_v9  ;;  %v288_v14 = vsel %vm287_vm4, %v752_v11, %v732_v50  ;;  %v290_v16 = vsel %vm287_vm4, %v733_v49, %v753_v10  ;;  %v404_v29 = vld [vmem:[#allocation2 + $0x38] sm:$0xff] }
  0xc8   : > { %v313_v17 = vsel %vm312_vm5, %v757_v13, %v737_v52  ;;  %v315_v18 = vsel %vm312_vm5, %v738_v51, %v758_v12  ;;  %632 = vmatprep.subr.bf16.mxu1 %v882_v15  ;;  %294 = vst [vmem:[#allocation2 + $0x30] sm:$0xf] %v288_v14  ;;  %296 = vst [vmem:[#allocation2 + $0x40] sm:$0xf] %v290_v16  ;;  %v761_v19 = vpop.permute.xlu0 %760  ;;  %v766_v20 = vpop.permute.xlu1 %765 }
  0xc9   : > { %319 = vst [vmem:[#allocation2 + $0x30] sm:$0xf0] %v313_v17  ;;  %321 = vst [vmem:[#allocation2 + $0x40] sm:$0xf0] %v315_v18  ;;  %v763_v21 = vunpack.i.h.bf16 %v761_v19  ;;  %v762_v22 = vunpack.i.l.bf16 %v761_v19  ;;  %v768_v23 = vunpack.i.h.bf16 %v766_v20  ;;  %v767_v24 = vunpack.i.l.bf16 %v766_v20 }
  0xcb   : > { %v338_v25 = vsel %vm337_vm6, %v762_v22, %v742_v61  ;;  %v340_v26 = vsel %vm337_vm6, %v743_v60, %v763_v21  ;;  %v363_v27 = vsel %vm362_vm7, %v767_v24, %v747_v63  ;;  %v365_v28 = vsel %vm362_vm7, %v748_v62, %v768_v23  ;;  %v407_v30 = vld [vmem:[#allocation2 + $0x50] sm:$0xff] }
  0xcc   : > { %344 = vst [vmem:[#allocation2 + $0x48] sm:$0xf] %v338_v25  ;;  %346 = vst [vmem:[#allocation2 + $0x58] sm:$0xf] %v340_v26  ;;  %v771_v31 = vpop.permute.xlu0 %770  ;;  %v776_v32 = vpop.permute.xlu1 %775  ;;  %v416_v33 = vpack.c.bf16 %v407_v30, %v404_v29 }
  0xcd   : > { %369 = vst [vmem:[#allocation2 + $0x48] sm:$0xf0] %v363_v27  ;;  %371 = vst [vmem:[#allocation2 + $0x58] sm:$0xf0] %v365_v28  ;;  %v773_v34 = vunpack.i.h.bf16 %v771_v31  ;;  %v772_v35 = vunpack.i.l.bf16 %v771_v31  ;;  %v778_v36 = vunpack.i.h.bf16 %v776_v32  ;;  %v777_v37 = vunpack.i.l.bf16 %v776_v32 }
  0xce   : > { %444 = vmatprep.subr.bf16.mxu0 %v416_v33 }
  0xcf   : > { %v388_v38 = vsel %vm387_vm8, %v772_v35, %v773_v34  ;;  %v389_v39 = vsel %vm387_vm8, %v773_v34, %v777_v37  ;;  %v390_v40 = vsel %vm387_vm8, %v777_v37, %v778_v36 }
  0xd0   : > { %394 = vst [vmem:[#allocation2 + $0x60] sm:$0xf] %v388_v38  ;;  %395 = vst [vmem:[#allocation2 + $0x68] sm:$0xf] %v389_v39  ;;  %v403_v41 = vld [vmem:[#allocation2 + $0x30] sm:$0xff]  ;;  %v405_v43 = vld [vmem:[#allocation2 + $0x40] sm:$0xff] }
  0xd1   : > { %396 = vst [vmem:[#allocation2 + $0x70] sm:$0xf] %v390_v40 }
  0xd4   : > { %v406_v42 = vld [vmem:[#allocation2 + $0x48] sm:$0xff]  ;;  %v408_v44 = vld [vmem:[#allocation2 + $0x58] sm:$0xff] }
  0xd5   : > { %v415_v45 = vpack.c.bf16 %v406_v42, %v403_v41  ;;  %v417_v46 = vpack.c.bf16 %v408_v44, %v405_v43 }
  0xd7   : > { %445 = vmatpush1.bf16.msra.mxu0 %v415_v45  ;;  %633 = vmatpush3.bf16.msra.mxu1 %v417_v46  ;;  %v410_v47 = vld [vmem:[#allocation2 + $0x68] sm:$0xf]  ;;  %v409_v48 = vld [vmem:[#allocation2 + $0x60] sm:$0xf] }
  0xd8   : > { %634 = vmatprep.subr.bf16.mxu1 %v882_v15  ;;  %v411_v49 = vld [vmem:[#allocation2 + $0x70] sm:$0xf]  ;;  %v419_v50 = vpack.c.bf16 %v410_v47, %v410_v47  ;;  %v418_v51 = vpack.c.bf16 %v409_v48, %v409_v48 }
  0xd9   : > { %v420_v52 = vpack.c.bf16 %v411_v49, %v411_v49 }
  0xda   : > { %619 = vmatprep.subr.msk.bf16.mxu0 %vm432_vm9, %v419_v50  ;;  %v434_v53 = vsel %vm432_vm9, %v418_v51, 0 }
  0xdb   : > { %v440_v54 = vsel %vm432_vm9, %v420_v52, 0  ;;  %447 = vmatpush1.bf16.msra.mxu0 %v434_v53 }
  0xdc   : > { %635 = vmatpush3.bf16.msra.mxu1 %v440_v54 }
  0xdd   : > { %v426_v15 = vpop.permute.xlu0 %425 }
  0xde   : > { %620 = vmatmul.mubr.msk.bf16.vlgmr.msra.gmra.mrb[0].mxu0 %vm428_vm10, %v421_v55 }
  0xdf   : > { %637 = vmatmul.mubr.msk.bf16.vlgmr.msra.gmra.mrb[0].mxu1 %vm428_vm10, %v421_v55 }
 0x1b1   : > { %v476_v56 = vpop.f32.mrb[0].mxu0 }
 0x1b2   : > { %v517_v57 = vpop.f32.mrb[0].mxu1  ;;  %v477_v58 = vadd.f32 %v476_v56, %v426_v15  ;;  %v478_v60 = vpop.f32.mrb[1].mxu0 }
 0x1b3   : > { %v518_v59 = vadd.f32 %v517_v57, %v426_v15  ;;  %v638_v61 = vpop.f32.mrb[1].mxu1  ;;  %v479_v62 = vadd.f32 %v478_v60, %v426_v15  ;;  %v480_v63 = vpop.f32.mrb[2].mxu0 }
 0x1b4   : > { %v520_v0 = vpop.f32.mrb[2].mxu1  ;;  %523 = vst [vmem:[%s186_s30] sm:$0xff] %v477_v58  ;;  %v481_v1 = vpop.f32.mrb[3].mxu0 }
 0x1b5   : > { %525 = vst [vmem:[%s186_s30 + $0x10] sm:$0xff] %v518_v59  ;;  %v639_v2 = vpop.f32.mrb[3].mxu1  ;;  %524 = vst [vmem:[%s186_s30 + $0x8] sm:$0xff] %v479_v62 }
 0x1b6   : > { %823 = shalt.err (!%p820_p4)
}
 0x1b7   : > { %s824_s29 = scalar_lea.hbm %s1060_s6, 384  ;;  %s828_s19 = scalar_lea.hbm %s1107_s3, 768 }
 0x1b8   : > { %p825_p5 = scmp.ne.s32.totalorder %s1060_s6, %s824_s29  ;;  %p829_p0 = scmp.lt.u32.totalorder %s1060_s6, %s1107_s3 }
 0x1b9   : > { %p830_p1 = scmp.lt.u32.totalorder %s828_s19, %s824_s29  ;;  %p832_p6 = scmp.lt.u32.totalorder %s824_s29, %s1060_s6 }
 0x1ba   : > { %p826_p8 = pnand %p825_p5, %p1116_p11 }
 0x1bb   : > { %p831_p3 = por %p830_p1, %p829_p0 }
 0x1bc   : > { %p827_p9 = pneg %p826_p8 }
 0x1bd   : > { %p833_p12 = por %p832_p6, %p831_p3 }
 0x1bf   : > { %p834_p13 = pnand %p833_p12, %p827_p9 }
 0x1c1   : > { %837 = shalt.err (!%p834_p13)
}
 0x1c2   : > { %644 = dma.vmem_to_hbm [thread:$0]  (%p1116_p11), %s1062_s5, 384, %s1060_s6, %s527_s16  }
 0x1c3 PF: > { %s553_s26 = sand.u32 1, %s864_s12   ;;  %p1117_p7 = scmp.ne.s32.totalorder %s1112_s25, 0 }
 0x1c4   : > { %p1118_p10 = scmp.ge.s32.totalorder %s876_s15, 2  ;;  %s554_s27 = scalar_lea.sflag [#allocation5], %s553_s26 }
 0x1c6   : > { %p651_p2 = pnand %p1118_p10, %p1117_p7 }
 0x1c8   : > { %859 = dma.done.wait (!%p651_p2), %s554_s27, 384  }
 0x1c9   : > { %861 = vsyncadd (!%p651_p2), %s554_s27, 4294966912  ;;  %p16_p4 = scmp.ge.s32.totalorder %s936_s18, 4   ;;  %s1119_s12 = smov %s868_s13 }
 0x1ca   : > { %s1120_s13 = smov %s872_s14  ;;  %s1121_s14 = smov %s948_s21 }
 0x1cb   : > { %s1122_s15 = smov %s936_s18  ;;  %18 = sbr.rel (!%p16_p4) target bundleno = 5 (0x5), region = 77 }
 0x1d2   :  { %559 = vsyncpa [#allocation4], 1 }
 0x1d3   :  { %561 = vsyncpa [#allocation4 + $0x1], 1 }
 0x1d4   :  { %562 = vsyncpa [#allocation5], 1 }
 0x1d5   :  { %564 = vsyncpa [#allocation5 + $0x1], 1 }

</bundles_post_ra>
